<compile_context>
chip_gen: v6e
topology: v6e:2x2x1
jax: 0.10.0
libtpu: 0.0.40
codegen_flags: <defaults>
</compile_context>

<pallas_src>
import functools

import jax
import jax.numpy as jnp
from jax.experimental import pallas as pl
from jax.experimental.pallas import tpu as pltpu


# ----------------------------------------------------------------------------
# Shared cell math (pure jnp).  Used verbatim inside the Pallas kernels and,
# for validation, as plain JAX (identical-math reference).
# ----------------------------------------------------------------------------
def dcgru_cell_math(a_blk, x, h, wg, bg, wc, bc, *, K, use_tanh=True):
    """One DCGRU cell update in flat (B*N, features) row layout.

    a_blk: (B*N, B*N) bf16 block-diagonal support kron(I_B, A)
    x    : (B*N, Din) f32 inputs
    h    : (B*N, H)   f32 hidden state
    wg   : (M*(Din+H), 2H) bf16, m-major rows   (fused r|u gate weights)
    bg   : (1, 2H) f32
    wc   : (M*(Din+H), H)  bf16, m-major rows   (candidate weights)
    bc   : (1, H)  f32
    Returns the new hidden state, (B*N, H) f32.
    """
    Din = x.shape[-1]
    H = h.shape[-1]
    act = jnp.tanh if use_tanh else jax.nn.relu

    def diffuse(t):
        # Whole batch diffused with a single MXU matmul (block-diagonal support).
        return jnp.dot(a_blk, t.astype(jnp.bfloat16),
                       preferred_element_type=jnp.float32)

    def cheb(t0):
        # Diffusion series T_0 .. T_K (Chebyshev-style recursion of the torch code).
        series = [t0]
        if K >= 1:
            t1 = diffuse(t0)
            series.append(t1)
            t_prev, t_cur = t0, t1
            for _ in range(2, K + 1):
                t_next = 2.0 * diffuse(t_cur) - t_prev
                series.append(t_next)
                t_prev, t_cur = t_cur, t_next
        return series

    # One series over [x, h]; by linearity T_m([x, h]) = [T_m x, T_m h].
    Txh = cheb(jnp.concatenate([x, h], axis=-1))              # M tensors of (B*N, Din+H)

    # Fused r|u gate: ONE (B*N, M*F) @ (M*F, 2H) MXU matmul, bias folded in once.
    Xg = jnp.concatenate(Txh, axis=-1)
    gates = jnp.dot(Xg.astype(jnp.bfloat16), wg,
                    preferred_element_type=jnp.float32) + bg
    r = jax.nn.sigmoid(gates[:, :H])                          # (B*N, H)
    u = jax.nn.sigmoid(gates[:, H:])                          # (B*N, H)

    # Candidate: reuse the x half of Txh; only the r*h series is recomputed.
    Trh = cheb(r * h)                                         # M tensors of (B*N, H)
    xc_parts = []
    for m in range(K + 1):
        xc_parts.append(Txh[m][:, :Din])                      # T_m x
        xc_parts.append(Trh[m])                               # T_m (r*h)
    Xc = jnp.concatenate(xc_parts, axis=-1)
    c = act(jnp.dot(Xc.astype(jnp.bfloat16), wc,
                    preferred_element_type=jnp.float32) + bc)

    return u * h + (1.0 - u) * c                              # GRU state update


# ----------------------------------------------------------------------------
# Pallas kernels
# ----------------------------------------------------------------------------
def _dcgru_step_kernel(a_ref, x_ref, h_ref, wg_ref, bg_ref, wc_ref, bc_ref,
                       out_ref, *, K, use_tanh):
    out_ref[...] = dcgru_cell_math(
        a_ref[...], x_ref[...], h_ref[...],
        wg_ref[...], bg_ref[...], wc_ref[...], bc_ref[...],
        K=K, use_tanh=use_tanh).astype(out_ref.dtype)


def _dcgru_rollout_kernel(a_ref, x_ref, h0_ref, wg_ref, bg_ref, wc_ref, bc_ref,
                          out_ref, h_scr, *, K, use_tanh):
    @pl.when(pl.program_id(0) == 0)
    def _():
        h_scr[...] = h0_ref[...]

    new_h = dcgru_cell_math(
        a_ref[...], x_ref[0], h_scr[...],
        wg_ref[...], bg_ref[...], wc_ref[...], bc_ref[...],
        K=K, use_tanh=use_tanh)
    h_scr[...] = new_h            # recurrent state stays in VMEM across grid steps
    out_ref[0] = new_h.astype(out_ref.dtype)


# ----------------------------------------------------------------------------
# Wrappers (pallas_call setup)
# ----------------------------------------------------------------------------
def _block_diag_support(support, batch_size):
    # kron(I_B, A): lets the kernel diffuse the whole batch with one MXU matmul in the
    # flat (B*N, features) layout.  Built once per call, outside the kernel.
    eye = jnp.eye(batch_size, dtype=jnp.float32)
    return jnp.kron(eye, support.astype(jnp.float32)).astype(jnp.bfloat16)


@functools.partial(jax.jit,
                   static_argnames=("K", "num_nodes", "num_units", "input_dim", "use_tanh"))
def dcgru_cell_forward(support, inputs, state, params, *,
                       K, num_nodes, num_units, input_dim, use_tanh=True):
    """Pallas equivalent of DCGRUCell.forward.

    support: (N, N) dense support matrix ('laplacian' filter -> 1 support)
    inputs : (B, N * input_dim)
    state  : (B, N * num_units)
    Returns (output, new_state), both (B, N * num_units) with output == new_state.
    """
    B = inputs.shape[0]
    N, H, Din = num_nodes, num_units, input_dim
    BN = B * N
    a_blk = _block_diag_support(support, B)
    x = inputs.reshape(BN, Din).astype(jnp.float32)
    h = state.reshape(BN, H).astype(jnp.float32)
    # Single fused kernel invocation: no grid, all (tiny) operands resident in VMEM.
    new_h = pl.pallas_call(
        functools.partial(_dcgru_step_kernel, K=K, use_tanh=use_tanh),
        out_shape=jax.ShapeDtypeStruct((BN, H), jnp.float32),
    )(a_blk, x, h, params["wg"], params["bg"], params["wc"], params["bc"])
    new_state = new_h.reshape(B, N * H)
    return new_state, new_state


@functools.partial(jax.jit,
                   static_argnames=("K", "num_nodes", "num_units", "input_dim", "use_tanh"))
def dcgru_cell_rollout(support, inputs_seq, init_state, params, *,
                       K, num_nodes, num_units, input_dim, use_tanh=True):
    """T sequential applications of DCGRUCell.forward fused into ONE pallas_call.

    inputs_seq: (T, B, N * input_dim);  init_state: (B, N * num_units)
    Returns all hidden states, (T, B, N * num_units).
    """
    T, B = inputs_seq.shape[:2]
    N, H, Din = num_nodes, num_units, input_dim
    BN = B * N
    M = K + 1
    feat = Din + H
    a_blk = _block_diag_support(support, B)
    x_seq = inputs_seq.reshape(T, BN, Din).astype(jnp.float32)
    h0 = init_state.reshape(BN, H).astype(jnp.float32)
    states = pl.pallas_call(
        functools.partial(_dcgru_rollout_kernel, K=K, use_tanh=use_tanh),
        out_shape=jax.ShapeDtypeStruct((T, BN, H), jnp.float32),
        grid=(T,),
        in_specs=[
            pl.BlockSpec((BN, BN), lambda t: (0, 0)),           # block-diag support (resident)
            pl.BlockSpec((1, BN, Din), lambda t: (t, 0, 0)),    # per-step input slice
            pl.BlockSpec((BN, H), lambda t: (0, 0)),            # initial hidden state
            pl.BlockSpec((M * feat, 2 * H), lambda t: (0, 0)),  # gate weights (resident)
            pl.BlockSpec((1, 2 * H), lambda t: (0, 0)),
            pl.BlockSpec((M * feat, H), lambda t: (0, 0)),      # candidate weights (resident)
            pl.BlockSpec((1, H), lambda t: (0, 0)),
        ],
        out_specs=pl.BlockSpec((1, BN, H), lambda t: (t, 0, 0)),
        scratch_shapes=[pltpu.VMEM((BN, H), jnp.float32)],      # recurrent state in VMEM
        compiler_params=pltpu.CompilerParams(
            # Time is a true recurrence -> sequential grid axis.
            dimension_semantics=("arbitrary",)),
    )(a_blk, x_seq, h0,
      params["wg"], params["bg"], params["wc"], params["bc"])
    return states.reshape(T, B, N * H)


# ----------------------------------------------------------------------------
# Parameter construction / reshaping glue
# ----------------------------------------------------------------------------
def xavier_normal(key, shape, gain=1.414):
    std = gain * (2.0 / (shape[0] + shape[1])) ** 0.5
    return std * jax.random.normal(key, shape, jnp.float32)


def prepare_cell_params(Wg, bg, Wc, bc, input_dim, hid_dim, K):
    """Torch DiffusionGraphConv flat weights (row index = f*M + m) -> fused m-major bf16
    layout (row index = m*F + f) consumed by the kernel."""
    feat = input_dim + hid_dim
    M = K + 1

    def reorder(W):
        out = W.shape[-1]
        return jnp.transpose(W.reshape(feat, M, out), (1, 0, 2)).reshape(M * feat, out)

    return {
        "wg": reorder(Wg).astype(jnp.bfloat16),
        "bg": bg.reshape(1, -1).astype(jnp.float32),
        "wc": reorder(Wc).astype(jnp.bfloat16),
        "bc": bc.reshape(1, -1).astype(jnp.float32),
    }


# ----------------------------------------------------------------------------
# Pure-JAX f32 reference mirroring the PyTorch module exactly
# ----------------------------------------------------------------------------
def ref_diffusion_graph_conv(supports, inputs, state, weight, biases,
                             num_nodes, max_diffusion_step):
    hp = jax.lax.Precision.HIGHEST
    B = inputs.shape[0]
    x_in = inputs.reshape(B, num_nodes, -1)
    st = state.reshape(B, num_nodes, -1)
    x0 = jnp.concatenate([x_in, st], axis=2)
    xs = [x0]
    for support in supports:
        if max_diffusion_step >= 1:
            x1 = jnp.einsum("nm,bmf->bnf", support, x0, precision=hp)
            xs.append(x1)
            xk_1, xk_2 = x1, x0
            for _ in range(2, max_diffusion_step + 1):
                x2 = 2.0 * jnp.einsum("nm,bmf->bnf", support, xk_1, precision=hp) - xk_2
                xs.append(x2)
                xk_1, xk_2 = x2, xk_1
    x = jnp.stack(xs, axis=1)                        # (B, M, N, F)
    x = jnp.transpose(x, (0, 2, 3, 1))               # (B, N, F, M)
    x = x.reshape(B * num_nodes, -1)                 # row feature index = f*M + m
    out = jnp.dot(x, weight, precision=hp) + biases
    return out.reshape(B, num_nodes * weight.shape[-1])


def ref_dcgru_cell(supports, inputs, state, flat_params,
                   num_nodes, num_units, max_diffusion_step, use_tanh=True):
    Wg, bg, Wc, bc = flat_params
    H = num_units
    value = jax.nn.sigmoid(ref_diffusion_graph_conv(
        supports, inputs, state, Wg, bg, num_nodes, max_diffusion_step))
    value = value.reshape(-1, num_nodes, 2 * H)
    r = value[..., :H].reshape(-1, num_nodes * H)
    u = value[..., H:].reshape(-1, num_nodes * H)
    c = ref_diffusion_graph_conv(supports, inputs, r * state, Wc, bc,
                                 num_nodes, max_diffusion_step)
    c = jnp.tanh(c) if use_tanh else jax.nn.relu(c)
    new_state = u * state + (1.0 - u) * c
    return new_state, new_state


# ----------------------------------------------------------------------------
if __name__ == "__main__":
    key = jax.random.PRNGKey(0)
    B, N = 2, 16            # batch, graph nodes
    Din = 4                 # input_dim
    H = 32                  # num_units (hidden)
    K = 2                   # max_diffusion_step
    T = 8                   # rollout length for the fused multi-step kernel
    M = K + 1
    Fdim = Din + H
    ks = jax.random.split(key, 8)

    # Synthetic scaled symmetric support ('laplacian' filter -> 1 dense support).
    A = jax.random.normal(ks[0], (N, N), jnp.float32)
    A = 0.3 * (A + A.T) / (2.0 * jnp.sqrt(jnp.float32(N)))

    inputs_seq = jax.random.normal(ks[1], (T, B, N * Din), jnp.float32)
    state0 = 0.1 * jax.random.normal(ks[2], (B, N * H), jnp.float32)

    # Torch-layout parameters (row index = f*M + m), xavier_normal_(gain=1.414).
    # (Torch inits biases to a constant; nonzero values here exercise the bias path.)
    Wg = xavier_normal(ks[3], (Fdim * M, 2 * H))
    Wc = xavier_normal(ks[4], (Fdim * M, H))
    bg = 0.05 * jax.random.normal(ks[5], (2 * H,), jnp.float32)
    bc = 0.05 * jax.random.normal(ks[6], (H,), jnp.float32)
    params = prepare_cell_params(Wg, bg, Wc, bc, Din, H, K)

    # --- single step: DCGRUCell.forward -------------------------------------
    out, new_state = dcgru_cell_forward(A, inputs_seq[0], state0, params,
                                        K=K, num_nodes=N, num_units=H, input_dim=Din)
    out = jax.block_until_ready(out)
    assert out.shape == (B, N * H), out.shape

    # Semantics check vs. the f32 torch-mirroring reference (kernel uses bf16 MXU inputs).
    ref_out, _ = ref_dcgru_cell([A], inputs_seq[0], state0, (Wg, bg, Wc, bc), N, H, K)
    err_f32 = float(jnp.max(jnp.abs(out - ref_out)))
    assert err_f32 < 3e-2, f"single-step mismatch vs f32 reference: {err_f32}"

    # Tight check: the identical bf16 math run as plain JAX (validates the Pallas plumbing).
    A_blk = jnp.kron(jnp.eye(B, dtype=jnp.float32), A).astype(jnp.bfloat16)
    same_math = dcgru_cell_math(A_blk, inputs_seq[0].reshape(B * N, Din),
                                state0.reshape(B * N, H),
                                params["wg"], params["bg"], params["wc"], params["bc"],
                                K=K, use_tanh=True)
    err_tight = float(jnp.max(jnp.abs(out.reshape(B * N, H) - same_math)))
    assert err_tight < 3e-3, f"single-step mismatch vs identical-math JAX: {err_tight}"

    # --- fused T-step recurrence: one pallas_call, state held in VMEM scratch ----
    states = dcgru_cell_rollout(A, inputs_seq, state0, params,
                                K=K, num_nodes=N, num_units=H, input_dim=Din)
    states = jax.block_until_ready(states)
    assert states.shape == (T, B, N * H), states.shape

    h = state0.reshape(B * N, H)
    ref_states = []
    for t in range(T):
        h = dcgru_cell_math(A_blk, inputs_seq[t].reshape(B * N, Din), h,
                            params["wg"], params["bg"], params["wc"], params["bc"],
                            K=K, use_tanh=True)
        ref_states.append(h.reshape(B, N * H))
    ref_states = jnp.stack(ref_states, axis=0)
    err_roll = float(jnp.max(jnp.abs(states - ref_states)))
    assert err_roll < 1e-2, f"rollout mismatch vs identical-math JAX: {err_roll}"

    print("KERNEL_OK")
</pallas_src>

<mosaic_0001>
module attributes {stable_mosaic.version = 11 : i64} {
  func.func @_dcgru_step_kernel(%arg0: memref<32x32xbf16, #tpu.memory_space<vmem>>, %arg1: memref<32x4xf32, #tpu.memory_space<vmem>>, %arg2: memref<32x32xf32, #tpu.memory_space<vmem>>, %arg3: memref<108x64xbf16, #tpu.memory_space<vmem>>, %arg4: memref<1x64xf32, #tpu.memory_space<vmem>>, %arg5: memref<108x32xbf16, #tpu.memory_space<vmem>>, %arg6: memref<1x32xf32, #tpu.memory_space<vmem>>, %arg7: memref<32x32xf32, #tpu.memory_space<vmem>>) attributes {dimension_semantics = [], scalar_prefetch = 0 : i64, scratch_operands = 0 : i64, tpu.core_type = #tpu.core_type<tc>} {
    %c0 = arith.constant 0 : index
    %c0_0 = arith.constant 0 : index
    %0 = vector.load %arg0[%c0, %c0_0] : memref<32x32xbf16, #tpu.memory_space<vmem>>, vector<32x32xbf16>
    %c0_1 = arith.constant 0 : index
    %c0_2 = arith.constant 0 : index
    %1 = vector.load %arg1[%c0_1, %c0_2] : memref<32x4xf32, #tpu.memory_space<vmem>>, vector<32x4xf32>
    %c0_3 = arith.constant 0 : index
    %c0_4 = arith.constant 0 : index
    %2 = vector.load %arg2[%c0_3, %c0_4] : memref<32x32xf32, #tpu.memory_space<vmem>>, vector<32x32xf32>
    %c0_5 = arith.constant 0 : index
    %c0_6 = arith.constant 0 : index
    %3 = vector.load %arg3[%c0_5, %c0_6] : memref<108x64xbf16, #tpu.memory_space<vmem>>, vector<108x64xbf16>
    %c0_7 = arith.constant 0 : index
    %c0_8 = arith.constant 0 : index
    %4 = vector.load %arg4[%c0_7, %c0_8] : memref<1x64xf32, #tpu.memory_space<vmem>>, vector<1x64xf32>
    %c0_9 = arith.constant 0 : index
    %c0_10 = arith.constant 0 : index
    %5 = vector.load %arg5[%c0_9, %c0_10] : memref<108x32xbf16, #tpu.memory_space<vmem>>, vector<108x32xbf16>
    %c0_11 = arith.constant 0 : index
    %c0_12 = arith.constant 0 : index
    %6 = vector.load %arg6[%c0_11, %c0_12] : memref<1x32xf32, #tpu.memory_space<vmem>>, vector<1x32xf32>
    %7 = tpu.concatenate %1, %2 in 1 : vector<32x4xf32>, vector<32x32xf32> -> vector<32x36xf32>
    %8 = arith.truncf %7 : vector<32x36xf32> to vector<32x36xbf16>
    %cst = arith.constant dense<0.000000e+00> : vector<32x36xf32>
    %9 = tpu.matmul %0, %8, %cst {dimension_numbers = #tpu.dot_dimension_numbers<[1], [0], [0], [1], [0, 0, 1, 1], [], []>} : vector<32x32xbf16>, vector<32x36xbf16>, vector<32x36xf32> -> vector<32x36xf32>
    %10 = arith.truncf %9 : vector<32x36xf32> to vector<32x36xbf16>
    %cst_13 = arith.constant dense<0.000000e+00> : vector<32x36xf32>
    %11 = tpu.matmul %0, %10, %cst_13 {dimension_numbers = #tpu.dot_dimension_numbers<[1], [0], [0], [1], [0, 0, 1, 1], [], []>} : vector<32x32xbf16>, vector<32x36xbf16>, vector<32x36xf32> -> vector<32x36xf32>
    %cst_14 = arith.constant 2.000000e+00 : f32
    %12 = vector.broadcast %cst_14 : f32 to vector<32x36xf32>
    %13 = arith.mulf %12, %11 : vector<32x36xf32>
    %14 = arith.subf %13, %7 : vector<32x36xf32>
    %15 = tpu.concatenate %7, %9, %14 in 1 : vector<32x36xf32>, vector<32x36xf32>, vector<32x36xf32> -> vector<32x108xf32>
    %16 = arith.truncf %15 : vector<32x108xf32> to vector<32x108xbf16>
    %cst_15 = arith.constant dense<0.000000e+00> : vector<32x64xf32>
    %17 = tpu.matmul %16, %3, %cst_15 {dimension_numbers = #tpu.dot_dimension_numbers<[1], [0], [0], [1], [0, 0, 1, 1], [], []>} : vector<32x108xbf16>, vector<108x64xbf16>, vector<32x64xf32> -> vector<32x64xf32>
    %18 = vector.broadcast %4 : vector<1x64xf32> to vector<32x64xf32>
    %19 = arith.addf %17, %18 : vector<32x64xf32>
    %20 = vector.extract_strided_slice %19 {offsets = [0, 0], sizes = [32, 32], strides = [1, 1]} : vector<32x64xf32> to vector<32x32xf32>
    %21 = arith.negf %20 : vector<32x32xf32>
    %22 = math.exp %21 : vector<32x32xf32>
    %cst_16 = arith.constant 1.000000e+00 : f32
    %23 = vector.broadcast %cst_16 : f32 to vector<32x32xf32>
    %24 = arith.addf %23, %22 : vector<32x32xf32>
    %25 = arith.divf %23, %24 : vector<32x32xf32>
    %26 = vector.extract_strided_slice %19 {offsets = [0, 32], sizes = [32, 32], strides = [1, 1]} : vector<32x64xf32> to vector<32x32xf32>
    %27 = arith.negf %26 : vector<32x32xf32>
    %28 = math.exp %27 : vector<32x32xf32>
    %cst_17 = arith.constant 1.000000e+00 : f32
    %29 = vector.broadcast %cst_17 : f32 to vector<32x32xf32>
    %30 = arith.addf %29, %28 : vector<32x32xf32>
    %31 = arith.divf %29, %30 : vector<32x32xf32>
    %32 = arith.mulf %25, %2 : vector<32x32xf32>
    %33 = arith.truncf %32 : vector<32x32xf32> to vector<32x32xbf16>
    %cst_18 = arith.constant dense<0.000000e+00> : vector<32x32xf32>
    %34 = tpu.matmul %0, %33, %cst_18 {dimension_numbers = #tpu.dot_dimension_numbers<[1], [0], [0], [1], [0, 0, 1, 1], [], []>} : vector<32x32xbf16>, vector<32x32xbf16>, vector<32x32xf32> -> vector<32x32xf32>
    %35 = arith.truncf %34 : vector<32x32xf32> to vector<32x32xbf16>
    %cst_19 = arith.constant dense<0.000000e+00> : vector<32x32xf32>
    %36 = tpu.matmul %0, %35, %cst_19 {dimension_numbers = #tpu.dot_dimension_numbers<[1], [0], [0], [1], [0, 0, 1, 1], [], []>} : vector<32x32xbf16>, vector<32x32xbf16>, vector<32x32xf32> -> vector<32x32xf32>
    %cst_20 = arith.constant 2.000000e+00 : f32
    %37 = vector.broadcast %cst_20 : f32 to vector<32x32xf32>
    %38 = arith.mulf %37, %36 : vector<32x32xf32>
    %39 = arith.subf %38, %32 : vector<32x32xf32>
    %40 = vector.extract_strided_slice %7 {offsets = [0, 0], sizes = [32, 4], strides = [1, 1]} : vector<32x36xf32> to vector<32x4xf32>
    %41 = vector.extract_strided_slice %9 {offsets = [0, 0], sizes = [32, 4], strides = [1, 1]} : vector<32x36xf32> to vector<32x4xf32>
    %42 = vector.extract_strided_slice %14 {offsets = [0, 0], sizes = [32, 4], strides = [1, 1]} : vector<32x36xf32> to vector<32x4xf32>
    %43 = tpu.concatenate %40, %32, %41, %34, %42, %39 in 1 : vector<32x4xf32>, vector<32x32xf32>, vector<32x4xf32>, vector<32x32xf32>, vector<32x4xf32>, vector<32x32xf32> -> vector<32x108xf32>
    %44 = arith.truncf %43 : vector<32x108xf32> to vector<32x108xbf16>
    %cst_21 = arith.constant dense<0.000000e+00> : vector<32x32xf32>
    %45 = tpu.matmul %44, %5, %cst_21 {dimension_numbers = #tpu.dot_dimension_numbers<[1], [0], [0], [1], [0, 0, 1, 1], [], []>} : vector<32x108xbf16>, vector<108x32xbf16>, vector<32x32xf32> -> vector<32x32xf32>
    %46 = vector.broadcast %6 : vector<1x32xf32> to vector<32x32xf32>
    %47 = arith.addf %45, %46 : vector<32x32xf32>
    %48 = math.tanh %47 : vector<32x32xf32>
    %49 = arith.mulf %31, %2 : vector<32x32xf32>
    %cst_22 = arith.constant 1.000000e+00 : f32
    %50 = vector.broadcast %cst_22 : f32 to vector<32x32xf32>
    %51 = arith.subf %50, %31 : vector<32x32xf32>
    %52 = arith.mulf %51, %48 : vector<32x32xf32>
    %53 = arith.addf %49, %52 : vector<32x32xf32>
    %c0_23 = arith.constant 0 : index
    %c0_24 = arith.constant 0 : index
    %54 = vector.load %arg7[%c0_23, %c0_24] : memref<32x32xf32, #tpu.memory_space<vmem>>, vector<32x32xf32>
    tpu.vector_store %arg7[%c0_23, %c0_24], %53 {strides = array<i32>} : memref<32x32xf32, #tpu.memory_space<vmem>>, vector<32x32xf32>,
    return
  }
}

</mosaic_0001>

<bundles_post_ra>
// kernel: dcgru_cell_forward.1
= control target key start
LH: loop header
LB: loop body
LE: loop exit
PB: predicated region body
PF: predicated region fallthrough
CT: control target
= control target key end

     0   :  { %s990_s28 = smov 4   ;;  %vm102_vm0 = vcmask 261120   ;;  %vm85_vm1 = vcmask 31744   ;;  %s991_s20 = smov 36   ;;  %vm315_vm2 = vcmask 1045504   ;;  %vm249_vm3 = vcmask 293888   ;;  %s1333_s2 = inlined_call_operand.vmem [shape: f32[32,32], index: 2, kind: input, shape index: {}]   ;;  %s1334_s0 = inlined_call_operand.vmem [shape: bf16[32,32], index: 0, kind: input, shape index: {}]   ;;  %s1335_s1 = inlined_call_operand.vmem [shape: f32[32,4], index: 1, kind: input, shape index: {}]   ;;  %s1336_s3 = inlined_call_operand.vmem [shape: bf16[108,64], index: 3, kind: input, shape index: {}]   ;;  %s1337_s4 = inlined_call_operand.vmem [shape: f32[1,64], index: 4, kind: input, shape index: {}]   ;;  %s1338_s5 = inlined_call_operand.vmem [shape: bf16[108,32], index: 5, kind: input, shape index: {}]   ;;  %s1339_s6 = inlined_call_operand.vmem [shape: f32[1,32], index: 6, kind: input, shape index: {}]   ;;  %s1340_s7 = inlined_call_operand.vmem [shape: f32[32,32], index: 7, kind: output, shape index: {}]  }
   0x1   :  { %v1040_v0 = vld [vmem:[%s1333_s2 + $0x10] sm:$0xff]  ;;  %v1045_v1 = vld [vmem:[%s1333_s2] sm:$0xff]  ;;  %v1054_v2 = vld [vmem:[%s1333_s2 + $0x18] sm:$0xff]  ;;  %vm254_vm4 = vcmask 588800   ;;  %vm308_vm5 = vcmask 883712   ;;  %s994_s24 = smov 76  }
   0x2   :  { %77 = vrot.lane.b32.xlu0 %v1040_v0, %s990_s28  ;;  %73 = vrot.lane.b32.xlu1 %v1045_v1, %s990_s28  ;;  %v1059_v3 = vld [vmem:[%s1333_s2 + $0x8] sm:$0xff]  ;;  %v1064_v4 = vld [vmem:[%s1334_s0] sm:$0xff]   ;;  %s992_s2 = smov 72   ;;  %vm562_vm6 = vcmask 326656   ;;  %vm571_vm7 = vcmask 621568  }
   0x3   :  { %827 = vmatprep.mubr.msk.bf16.mxu0 %vm102_vm0, %v1064_v4  ;;  %861 = vmatprep.mubr.msk.bf16.mxu1 %vm102_vm0, %v1064_v4  ;;  %v33_v7 = vld [vmem:[%s1335_s1 + $0x10] sm:$0xff]  ;;  %v31_v8 = vld [vmem:[%s1335_s1] sm:$0xff]  ;;  %v34_v9 = vld [vmem:[%s1335_s1 + $0x18] sm:$0xff] }
   0x4   :  { %v32_v10 = vld [vmem:[%s1335_s1 + $0x8] sm:$0xff]  ;;  %v952_v28 = vld [vmem:[%s1336_s3 + $0x30] sm:$0x3f]   ;;  %v954_v31 = vld [vmem:[%s1336_s3 + $0x20] sm:$0xff]  }
   0x5   :  { %v1105_v19 = vld [vmem:[%s1334_s0 + $0x8] sm:$0xff]   ;;  %v317_v30 = vsel %vm315_vm2, %v952_v28, 0  ;;  %v955_v32 = vld [vmem:[%s1336_s3 + $0x18] sm:$0xff]   ;;  %v956_v33 = vld [vmem:[%s1336_s3 + $0x10] sm:$0xff]  }
   0x6   :  { %79 = vrot.lane.b32.xlu0 %v1054_v2, %s990_s28  ;;  %75 = vrot.lane.b32.xlu1 %v1059_v3, %s990_s28  ;;  %v953_v29 = vld [vmem:[%s1336_s3 + $0x28] sm:$0xff]   ;;  %v958_v36 = vld [vmem:[%s1336_s3] sm:$0xff]  }
   0x7   :  { %v957_v34 = vld [vmem:[%s1336_s3 + $0x8] sm:$0xff]  }
  0x74   :  { %v78_v5 = vpop.permute.xlu0 %77  ;;  %v74_v6 = vpop.permute.xlu1 %73 }
  0x75   :  { %v1087_v13 = vsel %vm85_vm1, %v33_v7, %v78_v5  ;;  %v1090_v14 = vsel %vm85_vm1, %v31_v8, %v74_v6 }
  0x78   :  { %v80_v11 = vpop.permute.xlu0 %79  ;;  %v76_v12 = vpop.permute.xlu1 %75 }
  0x79   :  { %v1093_v15 = vsel %vm85_vm1, %v34_v9, %v80_v11  ;;  %v1096_v16 = vsel %vm85_vm1, %v32_v10, %v76_v12 }
  0x7a   :  { %v91_v17 = vpack.c.bf16 %v1093_v15, %v1087_v13  ;;  %v90_v18 = vpack.c.bf16 %v1096_v16, %v1090_v14 }
  0x7c   :  { %823 = vmatprep.subr.bf16.mxu0 %v91_v17 }
  0x7d   :  { %824 = vmatpush3.bf16.msra.mxu0 %v91_v17  ;;  %v761_v17 = vld [vmem:[%s1337_s4] ss:$0 sm:$0xff]  ;;  %s993_s4 = smov 40  }
  0x7e   :  { %825 = vmatprep.subr.bf16.mxu0 %v90_v18 }
  0x81   :  { %826 = vmatpush3.bf16.msra.mxu0 %v90_v18 }
  0x84   :  { %828 = vmatmul.mubr.msk.bf16.vlgmr.msra.gmra.mxu0 %vm102_vm0, %v1105_v19 }
  0x85   :  { %835 = vmatprep.mubr.msk.bf16.mxu0 %vm102_vm0, %v1064_v4 }
 0x144   :  { %v829_v20 = vpop.f32.mrf.mxu0 }
 0x146   :  { %v143_v21 = vpop.f32.mrf.mxu0 }
 0x148   :  { %v830_v22 = vpop.f32.mrf.mxu0 }
 0x149   :  { %v900_v23 = vpack.i.bf16 %v830_v22, %v829_v20  ;;  %v159_v24 = vpack.c.bf16 %v830_v22, %v829_v20 }
 0x14a   :  { %v146_v25 = vpop.f32.mrf.mxu0 }
 0x14b   :  { %v905_v26 = vpack.i.bf16 %v146_v25, %v143_v21  ;;  %v158_v27 = vpack.c.bf16 %v146_v25, %v143_v21  ;;  %901 = vrot.lane.b32.xlu1 %v900_v23, %s991_s20  ;;  %831 = vmatprep.subr.bf16.mxu0 %v159_v24 }
 0x14c   :  { %832 = vmatpush3.bf16.msra.mxu0 %v159_v24 }
 0x14d   :  { %906 = vrot.lane.b32.xlu0 %v905_v26, %s991_s20  ;;  %833 = vmatprep.subr.bf16.mxu0 %v158_v27 }
 0x150   :  { %834 = vmatpush3.bf16.msra.mxu0 %v158_v27 }
 0x151   :  { %891 = vmatprep.subr.msk.bf16.mxu0 %vm315_vm2, %v952_v28 }
 0x153   :  { %836 = vmatmul.mubr.msk.bf16.vlgmr.msra.gmra.mxu0 %vm102_vm0, %v1105_v19 }
 0x154   :  { %840 = vmatpush3.bf16.msra.mxu0 %v317_v30 }
 0x155   :  { %841 = vmatprep.subr.bf16.mxu0 %v953_v29 }
 0x158   :  { %842 = vmatpush3.bf16.msra.mxu0 %v953_v29 }
 0x159   :  { %843 = vmatprep.subr.bf16.mxu0 %v954_v31 }
 0x15c   :  { %844 = vmatpush3.bf16.msra.mxu0 %v954_v31 }
 0x15d   :  { %845 = vmatprep.subr.bf16.mxu0 %v955_v32 }
 0x160   :  { %846 = vmatpush3.bf16.msra.mxu0 %v955_v32 }
 0x161   :  { %847 = vmatprep.subr.bf16.mxu0 %v956_v33 }
 0x164   :  { %848 = vmatpush3.bf16.msra.mxu0 %v956_v33 }
 0x165   :  { %849 = vmatprep.subr.bf16.mxu0 %v957_v34 }
 0x168   :  { %850 = vmatpush3.bf16.msra.mxu0 %v957_v34 }
 0x169   :  { %851 = vmatprep.subr.bf16.mxu0 %v958_v36 }
 0x16c   :  { %852 = vmatpush3.bf16.msra.mxu0 %v958_v36 }
 0x1bd   :  { %v1140_v50 = vpop.permute.xlu1 %901 }
 0x1be   :  { %v904_v52 = vunpack.i.h.bf16 %v1140_v50  ;;  %v903_v53 = vunpack.i.l.bf16 %v1140_v50 }
 0x1bf   :  { %v1142_v51 = vpop.permute.xlu0 %906 }
 0x1c0   :  { %v909_v54 = vunpack.i.h.bf16 %v1142_v51  ;;  %v908_v55 = vunpack.i.l.bf16 %v1142_v51  ;;  %v253_v60 = vsel %vm249_vm3, %v1093_v15, %v904_v52  ;;  %v252_v61 = vsel %vm249_vm3, %v1087_v13, %v903_v53 }
 0x1c2   :  { %v251_v5 = vsel %vm249_vm3, %v1096_v16, %v909_v54  ;;  %v250_v6 = vsel %vm249_vm3, %v1090_v14, %v908_v55 }
 0x213   :  { %v837_v35 = vpop.f32.mrf.mxu0 }
 0x214   :  { %v211_v38 = vmul.f32 2.0, %v837_v35 }
 0x215   :  { %v194_v37 = vpop.f32.mrf.mxu0 }
 0x216   :  { %v209_v40 = vmul.f32 2.0, %v194_v37  ;;  %v215_v43 = vsub.f32 %v211_v38, %v1087_v13 }
 0x217   :  { %v838_v39 = vpop.f32.mrf.mxu0 }
 0x218   :  { %v212_v41 = vmul.f32 2.0, %v838_v39  ;;  %v213_v46 = vsub.f32 %v209_v40, %v1090_v14 }
 0x219   :  { %v197_v42 = vpop.f32.mrf.mxu0 }
 0x21a   :  { %v216_v44 = vsub.f32 %v212_v41, %v1093_v15  ;;  %v210_v45 = vmul.f32 2.0, %v197_v42 }
 0x21c   :  { %v214_v47 = vsub.f32 %v210_v45, %v1096_v16  ;;  %v915_v48 = vpack.i.bf16 %v216_v44, %v215_v43 }
 0x21e   :  { %916 = vrot.lane.b32.xlu1 %v915_v48, %s992_s2  ;;  %v910_v49 = vpack.i.bf16 %v214_v47, %v213_v46 }
 0x220   :  { %911 = vrot.lane.b32.xlu0 %v910_v49, %s992_s2 }
 0x290   :  { %v1148_v56 = vpop.permute.xlu1 %916 }
 0x291   :  { %v919_v57 = vunpack.i.h.bf16 %v1148_v56  ;;  %v918_v58 = vunpack.i.l.bf16 %v1148_v56 }
 0x292   :  { %v1152_v59 = vpop.permute.xlu0 %911 }
 0x293   :  { %v914_v62 = vunpack.i.h.bf16 %v1152_v59  ;;  %v913_v63 = vunpack.i.l.bf16 %v1152_v59  ;;  %v258_v7 = vsel %vm254_vm4, %v253_v60, %v919_v57  ;;  %v257_v8 = vsel %vm254_vm4, %v252_v61, %v918_v58 }
 0x294   :  { %v260_v12 = vpack.c.bf16 %v258_v7, %v257_v8 }
 0x295   :  { %v256_v9 = vsel %vm254_vm4, %v251_v5, %v914_v62  ;;  %v255_v10 = vsel %vm254_vm4, %v250_v6, %v913_v63 }
 0x296   :  { %v259_v11 = vpack.c.bf16 %v256_v9, %v255_v10 }
 0x298   :  { %853 = vmatprep.mubr.msk.bf16.mxu0 %vm308_vm5, %v259_v11 }
 0x299   :  { %854 = vmatmul.mubr.msk.bf16.vlgmr.msra.gmra.mxu0 %vm308_vm5, %v260_v12  ;;  %v960_v12 = vld [vmem:[%s1338_s5 + $0x28] sm:$0xff]  }
 0x359   :  { %v855_v18 = vpop.f32.mrf.mxu0 }
 0x35a   :  { %v362_v20 = vadd.f32 %v855_v18, %v761_v17  ;;  %v961_v18 = vld [vmem:[%s1338_s5 + $0x20] sm:$0xff]  }
 0x35b   :  { %v353_v21 = vpop.f32.mrf.mxu0 }
 0x35c   :  { %v773_v22 = vmul.f32 -1.442695, %v362_v20  ;;  %v354_v23 = vadd.f32 %v761_v17, %v353_v21  ;;  %v963_v20 = vld [vmem:[%s1338_s5 + $0x10] sm:$0xff]   ;;  %v964_v21 = vld [vmem:[%s1338_s5 + $0x8] sm:$0xff]  }
 0x35d   :  { %v856_v24 = vpop.f32.mrf.mxu0 }
 0x35e   :  { %966 = vpow2.f32 %v773_v22  ;;  %v771_v25 = vmul.f32 -1.442695, %v354_v23  ;;  %v365_v26 = vadd.f32 %v856_v24, %v761_v17  ;;  %v965_v23 = vld [vmem:[%s1338_s5] sm:$0xff]  }
 0x35f   :  { %v356_v27 = vpop.f32.mrf.mxu0 }
 0x360   :  { %968 = vpow2.f32 %v771_v25  ;;  %v774_v28 = vmul.f32 -1.442695, %v365_v26  ;;  %v357_v29 = vadd.f32 %v761_v17, %v356_v27 }
 0x362   :  { %970 = vpow2.f32 %v774_v28  ;;  %v772_v30 = vmul.f32 -1.442695, %v357_v29 }
 0x364   :  { %972 = vpow2.f32 %v772_v30 }
 0x36b   :  { %v967_v31 = vpop.eup %966 }
 0x36c   :  { %v382_v32 = vadd.f32 1.0, %v967_v31 }
 0x36d   :  { %v969_v33 = vpop.eup %968 }
 0x36e   :  { %v380_v34 = vadd.f32 1.0, %v969_v33  ;;  %974 = vrcp.f32 %v382_v32 }
 0x36f   :  { %v971_v35 = vpop.eup %970 }
 0x370   :  { %v383_v36 = vadd.f32 1.0, %v971_v35  ;;  %976 = vrcp.f32 %v380_v34 }
 0x371   :  { %v973_v37 = vpop.eup %972 }
 0x372   :  { %978 = vrcp.f32 %v383_v36  ;;  %v381_v38 = vadd.f32 1.0, %v973_v37 }
 0x374   :  { %980 = vrcp.f32 %v381_v38 }
 0x37b   :  { %v1189_v39 = vpop.eup %974 }
 0x37c   :  { %v1197_v42 = vmul.f32 %v1189_v39, %v1040_v0 }
 0x37d   :  { %v1191_v40 = vpop.eup %976 }
 0x37e   :  { %v1211_v47 = vmul.f32 %v1191_v40, %v1045_v1 }
 0x37f   :  { %v1193_v41 = vpop.eup %978 }
 0x380   :  { %v1201_v43 = vmul.f32 %v1193_v41, %v1054_v2 }
 0x381   :  { %v1203_v44 = vpop.eup %980 }
 0x382   :  { %v920_v45 = vpack.i.bf16 %v1201_v43, %v1197_v42  ;;  %v397_v46 = vpack.c.bf16 %v1201_v43, %v1197_v42  ;;  %v1215_v48 = vmul.f32 %v1203_v44, %v1059_v3 }
 0x384   :  { %921 = vrot.lane.b32.xlu1 %v920_v45, %s990_s28  ;;  %857 = vmatprep.subr.bf16.mxu1 %v397_v46  ;;  %v925_v49 = vpack.i.bf16 %v1215_v48, %v1211_v47  ;;  %v396_v60 = vpack.c.bf16 %v1215_v48, %v1211_v47 }
 0x385   :  { %858 = vmatpush3.bf16.msra.mxu1 %v397_v46 }
 0x386   :  { %926 = vrot.lane.b32.xlu0 %v925_v49, %s990_s28  ;;  %859 = vmatprep.subr.bf16.mxu1 %v396_v60 }
 0x389   :  { %860 = vmatpush3.bf16.msra.mxu1 %v396_v60 }
 0x38c   :  { %862 = vmatmul.mubr.msk.bf16.vlgmr.msra.gmra.mxu1 %vm102_vm0, %v1105_v19 }
 0x38d   :  { %869 = vmatprep.mubr.msk.bf16.mxu1 %vm102_vm0, %v1064_v4  ;;  %v959_v4 = vld [vmem:[%s1338_s5 + $0x30] sm:$0x3f]  }
 0x38e   :  { %v632_v17 = vsel %vm315_vm2, %v959_v4, 0 }
 0x3f6   :  { %v922_v37 = vpop.permute.xlu1 %921 }
 0x3f8   :  { %v927_v38 = vpop.permute.xlu0 %926 }
 0x3f9   :  { %v928_v45 = vunpack.i.l.bf16 %v927_v38  ;;  %v929_v46 = vunpack.i.h.bf16 %v927_v38 }
 0x44c   :  { %v863_v61 = vpop.f32.mrf.mxu1 }
 0x44e   :  { %v432_v5 = vpop.f32.mrf.mxu1 }
 0x450   :  { %v864_v6 = vpop.f32.mrf.mxu1 }
 0x451   :  { %v930_v7 = vpack.i.bf16 %v864_v6, %v863_v61  ;;  %v448_v8 = vpack.c.bf16 %v864_v6, %v863_v61 }
 0x452   :  { %v435_v9 = vpop.f32.mrf.mxu1 }
 0x453   :  { %v935_v10 = vpack.i.bf16 %v435_v9, %v432_v5  ;;  %v447_v11 = vpack.c.bf16 %v435_v9, %v432_v5  ;;  %931 = vrot.lane.b32.xlu1 %v930_v7, %s993_s4  ;;  %865 = vmatprep.subr.bf16.mxu1 %v448_v8 }
 0x454   :  { %866 = vmatpush3.bf16.msra.mxu1 %v448_v8 }
 0x455   :  { %936 = vrot.lane.b32.xlu0 %v935_v10, %s993_s4  ;;  %867 = vmatprep.subr.bf16.mxu1 %v447_v11 }
 0x458   :  { %868 = vmatpush3.bf16.msra.mxu1 %v447_v11 }
 0x459   :  { %892 = vmatprep.subr.msk.bf16.mxu1 %vm315_vm2, %v959_v4 }
 0x45b   :  { %870 = vmatmul.mubr.msk.bf16.vlgmr.msra.gmra.mxu1 %vm102_vm0, %v1105_v19  ;;  %v962_v19 = vld [vmem:[%s1338_s5 + $0x18] sm:$0xff]   ;;  %s995_s5 = smov 32  }
 0x45c   :  { %874 = vmatpush3.bf16.msra.mxu1 %v632_v17 }
 0x45d   :  { %875 = vmatprep.subr.bf16.mxu1 %v960_v12 }
 0x460   :  { %876 = vmatpush3.bf16.msra.mxu1 %v960_v12 }
 0x461   :  { %877 = vmatprep.subr.bf16.mxu1 %v961_v18 }
 0x464   :  { %878 = vmatpush3.bf16.msra.mxu1 %v961_v18 }
 0x465   :  { %879 = vmatprep.subr.bf16.mxu1 %v962_v19 }
 0x468   :  { %880 = vmatpush3.bf16.msra.mxu1 %v962_v19 }
 0x469   :  { %881 = vmatprep.subr.bf16.mxu1 %v963_v20 }
 0x46c   :  { %882 = vmatpush3.bf16.msra.mxu1 %v963_v20 }
 0x46d   :  { %883 = vmatprep.subr.bf16.mxu1 %v964_v21 }
 0x470   :  { %884 = vmatpush3.bf16.msra.mxu1 %v964_v21  ;;  %v779_v21 = vld [vmem:[%s1339_s6] ss:$0 sm:$0xff]  ;;  %s996_s6 = smov 96  }
 0x471   :  { %885 = vmatprep.subr.bf16.mxu1 %v965_v23 }
 0x474   :  { %886 = vmatpush3.bf16.msra.mxu1 %v965_v23 }
 0x51b   :  { %v871_v22 = vpop.f32.mrf.mxu1 }
 0x51c   :  { %v500_v25 = vmul.f32 2.0, %v871_v22 }
 0x51d   :  { %v483_v24 = vpop.f32.mrf.mxu1 }
 0x51e   :  { %v498_v27 = vmul.f32 2.0, %v483_v24  ;;  %v504_v30 = vsub.f32 %v500_v25, %v1197_v42  ;;  %v924_v42 = vunpack.i.h.bf16 %v922_v37 }
 0x51f   :  { %v872_v26 = vpop.f32.mrf.mxu1 }
 0x520   :  { %v501_v28 = vmul.f32 2.0, %v872_v26  ;;  %v502_v33 = vsub.f32 %v498_v27, %v1211_v47  ;;  %v932_v47 = vpop.permute.xlu1 %931 }
 0x521   :  { %v486_v29 = vpop.f32.mrf.mxu1  ;;  %v934_v49 = vunpack.i.h.bf16 %v932_v47  ;;  %v933_v60 = vunpack.i.l.bf16 %v932_v47 }
 0x522   :  { %v505_v31 = vsub.f32 %v501_v28, %v1201_v43  ;;  %v499_v32 = vmul.f32 2.0, %v486_v29  ;;  %v923_v43 = vunpack.i.l.bf16 %v922_v37 }
 0x524   :  { %v503_v34 = vsub.f32 %v499_v32, %v1215_v48  ;;  %v945_v35 = vpack.i.bf16 %v505_v31, %v504_v30  ;;  %v937_v48 = vpop.permute.xlu0 %936 }
 0x525   :  { %v939_v61 = vunpack.i.h.bf16 %v937_v48  ;;  %v938_v5 = vunpack.i.l.bf16 %v937_v48 }
 0x526   :  { %946 = vrot.lane.b32.xlu1 %v945_v35, %s994_s24  ;;  %v940_v36 = vpack.i.bf16 %v503_v34, %v502_v33  ;;  %v703_v33 = vsub.f32 1.0, %v1191_v40 }
 0x528   :  { %941 = vrot.lane.b32.xlu0 %v940_v36, %s994_s24 }
 0x52a   :  { %689 = vrot.lane.b32.xlu1 %v1059_v3, %s995_s5  ;;  %v557_v3 = vsel %vm85_vm1, %v1093_v15, %v924_v42  ;;  %v704_v42 = vsub.f32 1.0, %v1203_v44 }
 0x52b   :  { %v561_v15 = vsel %vm249_vm3, %v557_v3, %v904_v52 }
 0x52c   :  { %687 = vrot.lane.b32.xlu0 %v1045_v1, %s995_s5  ;;  %v556_v1 = vsel %vm85_vm1, %v1087_v13, %v923_v43  ;;  %v705_v43 = vsub.f32 1.0, %v1189_v39 }
 0x52d   :  { %v560_v6 = vsel %vm249_vm3, %v556_v1, %v903_v53 }
 0x52e   :  { %693 = vrot.lane.b32.xlu1 %v1054_v2, %s995_s5  ;;  %v554_v2 = vsel %vm85_vm1, %v1090_v14, %v928_v45  ;;  %v566_v14 = vsel %vm562_vm6, %v561_v15, %v934_v49  ;;  %v565_v7 = vsel %vm562_vm6, %v560_v6, %v933_v60 }
 0x52f   :  { %v558_v13 = vsel %vm249_vm3, %v554_v2, %v908_v55  ;;  %v569_v50 = vsel %vm254_vm4, %v565_v7, %v918_v58  ;;  %v570_v52 = vsel %vm254_vm4, %v566_v14, %v919_v57 }
 0x530   :  { %691 = vrot.lane.b32.xlu0 %v1040_v0, %s995_s5  ;;  %v555_v0 = vsel %vm85_vm1, %v1096_v16, %v929_v46  ;;  %v563_v10 = vsel %vm562_vm6, %v558_v13, %v938_v5 }
 0x531   :  { %v559_v16 = vsel %vm249_vm3, %v555_v0, %v909_v54  ;;  %v567_v17 = vsel %vm254_vm4, %v563_v10, %v913_v63 }
 0x532   :  { %v564_v9 = vsel %vm562_vm6, %v559_v16, %v939_v61 }
 0x533   :  { %v568_v18 = vsel %vm254_vm4, %v564_v9, %v914_v62 }
 0x598   :  { %v947_v8 = vpop.permute.xlu1 %946 }
 0x599   :  { %v949_v11 = vunpack.i.h.bf16 %v947_v8  ;;  %v948_v53 = vunpack.i.l.bf16 %v947_v8 }
 0x59a   :  { %v942_v4 = vpop.permute.xlu0 %941 }
 0x59b   :  { %v944_v55 = vunpack.i.h.bf16 %v942_v4  ;;  %v943_v12 = vunpack.i.l.bf16 %v942_v4  ;;  %v575_v51 = vsel %vm571_vm7, %v570_v52, %v949_v11  ;;  %v574_v54 = vsel %vm571_vm7, %v569_v50, %v948_v53 }
 0x59c   :  { %v577_v57 = vpack.c.bf16 %v575_v51, %v574_v54  ;;  %v690_v31 = vpop.permute.xlu1 %689 }
 0x59d   :  { %v573_v58 = vsel %vm571_vm7, %v568_v18, %v944_v55  ;;  %v572_v56 = vsel %vm571_vm7, %v567_v17, %v943_v12  ;;  %v700_v47 = vmul.f32 %v1203_v44, %v690_v31 }
 0x59e   :  { %v576_v19 = vpack.c.bf16 %v573_v58, %v572_v56  ;;  %v688_v30 = vpop.permute.xlu0 %687 }
 0x59f   :  { %v699_v36 = vmul.f32 %v1191_v40, %v688_v30  ;;  %v706_v40 = vsub.f32 1.0, %v1193_v41 }
 0x5a0   :  { %887 = vmatprep.mubr.msk.bf16.mxu1 %vm308_vm5, %v576_v19  ;;  %v694_v34 = vpop.permute.xlu1 %693 }
 0x5a1   :  { %888 = vmatmul.mubr.msk.bf16.vlgmr.msra.gmra.mxu1 %vm308_vm5, %v577_v57  ;;  %v702_v0 = vmul.f32 %v1193_v41, %v694_v34 }
 0x5a2   :  { %v692_v32 = vpop.permute.xlu0 %691 }
 0x5a3   :  { %v701_v48 = vmul.f32 %v1189_v39, %v692_v32 }
 0x661   :  { %v889_v20 = vpop.f32.mrf.mxu1 }
 0x662   :  { %v677_v59 = vadd.f32 %v889_v20, %v779_v21 }
 0x663   :  { %v668_v63 = vpop.f32.mrf.mxu1 }
 0x664   :  { %v669_v22 = vadd.f32 %v779_v21, %v668_v63 }
 0x665   :  { %v890_v23 = vpop.f32.mrf.mxu1 }
 0x666   :  { %982 = vtanh.f32 %v669_v22  ;;  %v680_v25 = vadd.f32 %v890_v23, %v779_v21 }
 0x667   :  { %v671_v62 = vpop.f32.mrf.mxu1  ;;  %984 = vtanh.f32 %v677_v59 }
 0x668   :  { %v672_v24 = vadd.f32 %v779_v21, %v671_v62 }
 0x66a   :  { %986 = vtanh.f32 %v672_v24 }
 0x66b   :  { %988 = vtanh.f32 %v680_v25 }
 0x673   :  { %v983_v26 = vpop.eup %982 }
 0x674   :  { %711 = vrot.lane.b32.xlu0 %v983_v26, %s995_s5  ;;  %v985_v27 = vpop.eup %984 }
 0x677   :  { %v987_v28 = vpop.eup %986 }
 0x678   :  { %713 = vrot.lane.b32.xlu1 %v987_v28, %s995_s5  ;;  %715 = vrot.lane.b32.xlu0 %v985_v27, %s995_s5  ;;  %v989_v29 = vpop.eup %988 }
 0x67c   :  { %717 = vrot.lane.b32.xlu1 %v989_v29, %s995_s5 }
 0x6e6   :  { %v712_v35 = vpop.permute.xlu0 %711 }
 0x6e7   :  { %v723_v37 = vmul.f32 %v712_v35, %v703_v33 }
 0x6e9   :  { %v727_v38 = vadd.f32 %v723_v37, %v699_v36 }
 0x6ea   :  { %v714_v45 = vpop.permute.xlu1 %713  ;;  %v716_v46 = vpop.permute.xlu0 %715 }
 0x6eb   :  { %v724_v3 = vmul.f32 %v714_v45, %v704_v42  ;;  %v725_v1 = vmul.f32 %v716_v46, %v705_v43  ;;  %735 = vrot.lane.b32.xlu0 %v727_v38, %s996_s6 }
 0x6ed   :  { %v728_v2 = vadd.f32 %v724_v3, %v700_v47  ;;  %v729_v49 = vadd.f32 %v725_v1, %v701_v48 }
 0x6ee   :  { %v718_v60 = vpop.permute.xlu1 %717 }
 0x6ef   :  { %v726_v61 = vmul.f32 %v718_v60, %v706_v40  ;;  %737 = vrot.lane.b32.xlu1 %v728_v2, %s996_s6  ;;  %739 = vrot.lane.b32.xlu0 %v729_v49, %s996_s6 }
 0x6f1   :  { %v730_v5 = vadd.f32 %v726_v61, %v702_v0 }
 0x6f3   :  { %741 = vrot.lane.b32.xlu1 %v730_v5, %s996_s6 }
 0x75d   :  { %v736_v6 = vpop.permute.xlu0 %735 }
 0x75e   :  { %747 = vst.msk [vmem:[%s1340_s7] sm:$0xff] %vm102_vm0, %v736_v6 }
 0x761   :  { %v738_v39 = vpop.permute.xlu1 %737  ;;  %v740_v44 = vpop.permute.xlu0 %739 }
 0x762   :  { %748 = vst.msk [vmem:[%s1340_s7 + $0x8] sm:$0xff] %vm102_vm0, %v738_v39  ;;  %749 = vst.msk [vmem:[%s1340_s7 + $0x10] sm:$0xff] %vm102_vm0, %v740_v44 }
 0x765   :  { %v742_v41 = vpop.permute.xlu1 %741 }
 0x766   :  { %750 = vst.msk [vmem:[%s1340_s7 + $0x18] sm:$0xff] %vm102_vm0, %v742_v41 }

</bundles_post_ra>
